<compile_context>
chip_gen: v6e
topology: v6e:2x2x1
jax: 0.10.0
libtpu: 0.0.40
codegen_flags: <defaults>
</compile_context>

<pallas_src>
import functools

import jax
import jax.numpy as jnp
from jax.experimental import pallas as pl
from jax.experimental.pallas import tpu as pltpu


def vae_decoder_kernel(x_ref, w1t_ref, b1_ref, w2t_ref, b2_ref, o_ref):
    # x: [TB, D]; w1t/w2t: [D, D] (in, out); b1/b2: [1, D] f32.
    cdt = w1t_ref.dtype  # MXU input dtype (f32, or bf16 on v6e/v7x)

    x = x_ref[...].astype(cdt)
    # fc1: x @ W1t + b1, ReLU.  Accumulate in f32, elementwise in f32.
    h1 = jnp.dot(x, w1t_ref[...], preferred_element_type=jnp.float32)
    h1 = jnp.maximum(h1 + b1_ref[...], 0.0)
    # fc2: h1 @ W2t + b2.
    out = jnp.dot(h1.astype(cdt), w2t_ref[...], preferred_element_type=jnp.float32)
    o_ref[...] = (out + b2_ref[...]).astype(o_ref.dtype)


@functools.partial(jax.jit, static_argnames=("block_b", "compute_dtype"))
def vae_decoder(x, w1, b1, w2, b2, *, block_b=None, compute_dtype=None):
    """Forward pass of VAEDecoder.

    x: [B, D]; w1, w2: [D, D] in PyTorch nn.Linear [out, in] convention;
    b1, b2: [D].
    compute_dtype: optional MXU input dtype (e.g. jnp.bfloat16 on v6e/v7x);
    accumulation and elementwise math stay f32.
    """
    B, D = x.shape

    # Pre-transpose weights in the wrapper -> kernel sees [in, out]; no XLU work.
    w1t = jnp.transpose(w1)
    w2t = jnp.transpose(w2)
    if compute_dtype is not None:
        w1t = w1t.astype(compute_dtype)
        w2t = w2t.astype(compute_dtype)
    b1 = b1.reshape(1, D).astype(jnp.float32)
    b2 = b2.reshape(1, D).astype(jnp.float32)

    # Batch tile: multiple of 8 (sublane rule); pad B up so the tile divides it.
    if block_b is None:
        block_b = min(128, max(8, B))
    block_b = ((block_b + 7) // 8) * 8
    n_blocks = pl.cdiv(B, block_b)
    b_padded = n_blocks * block_b
    if b_padded != B:
        x = jnp.pad(x, ((0, b_padded - B), (0, 0)))

    out = pl.pallas_call(
        vae_decoder_kernel,
        out_shape=jax.ShapeDtypeStruct((b_padded, D), x.dtype),
        grid_spec=pltpu.PrefetchScalarGridSpec(
            num_scalar_prefetch=0,
            grid=(n_blocks,),
            in_specs=[
                pl.BlockSpec((block_b, D), lambda i: (i, 0)),  # x: streamed per tile
                pl.BlockSpec((D, D), lambda i: (0, 0)),        # W1t: VMEM-resident
                pl.BlockSpec((1, D), lambda i: (0, 0)),        # b1: VMEM-resident
                pl.BlockSpec((D, D), lambda i: (0, 0)),        # W2t: VMEM-resident
                pl.BlockSpec((1, D), lambda i: (0, 0)),        # b2: VMEM-resident
            ],
            out_specs=pl.BlockSpec((block_b, D), lambda i: (i, 0)),
        ),
        compiler_params=pltpu.CompilerParams(
            dimension_semantics=("parallel",),
        ),
    )(x, w1t, b1, w2t, b2)

    return out[:B]


def vae_decoder_ref(x, w1, b1, w2, b2):
    h1 = jnp.maximum(x @ w1.T + b1, 0.0)
    return h1 @ w2.T + b2


if __name__ == "__main__":
    embed_dim = 32
    batch = 64          # small, but enough rows to exercise the batch grid
    block_b = 16        # 4 grid steps -> pipelined x/o DMA, parallel axis

    key = jax.random.PRNGKey(0)
    k_x, k_w1, k_b1, k_w2, k_b2 = jax.random.split(key, 5)

    # Deterministic synthetic parameters (PyTorch nn.Linear-style uniform init).
    bound = 1.0 / jnp.sqrt(embed_dim)
    x = jax.random.normal(k_x, (batch, embed_dim), dtype=jnp.float32)
    w1 = jax.random.uniform(k_w1, (embed_dim, embed_dim), jnp.float32, -bound, bound)
    b1 = jax.random.uniform(k_b1, (embed_dim,), jnp.float32, -bound, bound)
    w2 = jax.random.uniform(k_w2, (embed_dim, embed_dim), jnp.float32, -bound, bound)
    b2 = jax.random.uniform(k_b2, (embed_dim,), jnp.float32, -bound, bound)

    ref = vae_decoder_ref(x, w1, b1, w2, b2)

    # f32 path: exact-tolerance check.
    out = jax.block_until_ready(vae_decoder(x, w1, b1, w2, b2, block_b=block_b))
    assert out.shape == (batch, embed_dim)
    assert jnp.allclose(out, ref, atol=1e-5, rtol=1e-5)

    # bf16 MXU-input path (v6e/v7x recommendation): f32 accumulation, looser tol.
    out_bf16 = jax.block_until_ready(
        vae_decoder(x, w1, b1, w2, b2, block_b=block_b, compute_dtype=jnp.bfloat16)
    )
    assert out_bf16.shape == (batch, embed_dim)
    assert jnp.allclose(out_bf16, ref, atol=5e-2, rtol=5e-2)

    print("KERNEL_OK")
</pallas_src>

<mosaic_0001>
module attributes {stable_mosaic.version = 11 : i64} {
  func.func @vae_decoder_kernel(%arg0: i32, %arg1: memref<16x32xf32, #tpu.memory_space<vmem>>, %arg2: memref<32x32xf32, #tpu.memory_space<vmem>>, %arg3: memref<1x32xf32, #tpu.memory_space<vmem>>, %arg4: memref<32x32xf32, #tpu.memory_space<vmem>>, %arg5: memref<1x32xf32, #tpu.memory_space<vmem>>, %arg6: memref<16x32xf32, #tpu.memory_space<vmem>>) attributes {dimension_semantics = [#tpu.dimension_semantics<parallel>], iteration_bounds = array<i64: 4>, scalar_prefetch = 0 : i64, scratch_operands = 0 : i64, tpu.core_type = #tpu.core_type<tc>, window_params = [{transform_indices = @transform_0, window_bounds = array<i64: 16, 32>}, {pipeline_mode = #tpu.pipeline_mode<synchronous>, transform_indices = @transform_1, window_bounds = array<i64: 32, 32>}, {pipeline_mode = #tpu.pipeline_mode<synchronous>, transform_indices = @transform_2, window_bounds = array<i64: 1, 32>}, {pipeline_mode = #tpu.pipeline_mode<synchronous>, transform_indices = @transform_3, window_bounds = array<i64: 32, 32>}, {pipeline_mode = #tpu.pipeline_mode<synchronous>, transform_indices = @transform_4, window_bounds = array<i64: 1, 32>}, {transform_indices = @transform_5, window_bounds = array<i64: 16, 32>}]} {
    %c0 = arith.constant 0 : index
    %c0_0 = arith.constant 0 : index
    %0 = vector.load %arg1[%c0, %c0_0] : memref<16x32xf32, #tpu.memory_space<vmem>>, vector<16x32xf32>
    %c0_1 = arith.constant 0 : index
    %c0_2 = arith.constant 0 : index
    %1 = vector.load %arg2[%c0_1, %c0_2] : memref<32x32xf32, #tpu.memory_space<vmem>>, vector<32x32xf32>
    %cst = arith.constant dense<0.000000e+00> : vector<16x32xf32>
    %2 = tpu.matmul %0, %1, %cst {dimension_numbers = #tpu.dot_dimension_numbers<[1], [0], [0], [1], [0, 0, 1, 1], [], []>} : vector<16x32xf32>, vector<32x32xf32>, vector<16x32xf32> -> vector<16x32xf32>
    %c0_3 = arith.constant 0 : index
    %c0_4 = arith.constant 0 : index
    %3 = vector.load %arg3[%c0_3, %c0_4] : memref<1x32xf32, #tpu.memory_space<vmem>>, vector<1x32xf32>
    %4 = vector.broadcast %3 : vector<1x32xf32> to vector<16x32xf32>
    %5 = arith.addf %2, %4 : vector<16x32xf32>
    %cst_5 = arith.constant 0.000000e+00 : f32
    %6 = vector.broadcast %cst_5 : f32 to vector<16x32xf32>
    %7 = arith.maximumf %5, %6 : vector<16x32xf32>
    %c0_6 = arith.constant 0 : index
    %c0_7 = arith.constant 0 : index
    %8 = vector.load %arg4[%c0_6, %c0_7] : memref<32x32xf32, #tpu.memory_space<vmem>>, vector<32x32xf32>
    %cst_8 = arith.constant dense<0.000000e+00> : vector<16x32xf32>
    %9 = tpu.matmul %7, %8, %cst_8 {dimension_numbers = #tpu.dot_dimension_numbers<[1], [0], [0], [1], [0, 0, 1, 1], [], []>} : vector<16x32xf32>, vector<32x32xf32>, vector<16x32xf32> -> vector<16x32xf32>
    %c0_9 = arith.constant 0 : index
    %c0_10 = arith.constant 0 : index
    %10 = vector.load %arg5[%c0_9, %c0_10] : memref<1x32xf32, #tpu.memory_space<vmem>>, vector<1x32xf32>
    %11 = vector.broadcast %10 : vector<1x32xf32> to vector<16x32xf32>
    %12 = arith.addf %9, %11 : vector<16x32xf32>
    %c0_11 = arith.constant 0 : index
    %c0_12 = arith.constant 0 : index
    %13 = vector.load %arg6[%c0_11, %c0_12] : memref<16x32xf32, #tpu.memory_space<vmem>>, vector<16x32xf32>
    tpu.vector_store %arg6[%c0_11, %c0_12], %12 {strides = array<i32>} : memref<16x32xf32, #tpu.memory_space<vmem>>, vector<16x32xf32>,
    return
  }
  func.func @transform_0(%arg0: i32) -> (i32, i32) {
    %c0_i32 = arith.constant 0 : i32
    %c0_i32_0 = arith.constant 0 : i32
    return %arg0, %c0_i32 : i32, i32
  }
  func.func @transform_1(%arg0: i32) -> (i32, i32) {
    %c0_i32 = arith.constant 0 : i32
    %c0_i32_0 = arith.constant 0 : i32
    %c0_i32_1 = arith.constant 0 : i32
    return %c0_i32, %c0_i32_0 : i32, i32
  }
  func.func @transform_2(%arg0: i32) -> (i32, i32) {
    %c0_i32 = arith.constant 0 : i32
    %c0_i32_0 = arith.constant 0 : i32
    %c0_i32_1 = arith.constant 0 : i32
    return %c0_i32, %c0_i32_0 : i32, i32
  }
  func.func @transform_3(%arg0: i32) -> (i32, i32) {
    %c0_i32 = arith.constant 0 : i32
    %c0_i32_0 = arith.constant 0 : i32
    %c0_i32_1 = arith.constant 0 : i32
    return %c0_i32, %c0_i32_0 : i32, i32
  }
  func.func @transform_4(%arg0: i32) -> (i32, i32) {
    %c0_i32 = arith.constant 0 : i32
    %c0_i32_0 = arith.constant 0 : i32
    %c0_i32_1 = arith.constant 0 : i32
    return %c0_i32, %c0_i32_0 : i32, i32
  }
  func.func @transform_5(%arg0: i32) -> (i32, i32) {
    %c0_i32 = arith.constant 0 : i32
    %c0_i32_0 = arith.constant 0 : i32
    return %arg0, %c0_i32 : i32, i32
  }
}

</mosaic_0001>

<bundles_post_ra>
// kernel: vae_decoder.1
= control target key start
LH: loop header
LB: loop body
LE: loop exit
PB: predicated region body
PF: predicated region fallthrough
CT: control target
= control target key end

     0   :  { %s572_s18 = smov 0   ;;  %s632_s0 = inlined_call_operand.vmem [shape: f32[64,32], index: 0, kind: input, shape index: {}]   ;;  %s633_s1 = inlined_call_operand.vmem [shape: f32[32,32], index: 1, kind: input, shape index: {}]   ;;  %s634_s2 = inlined_call_operand.vmem [shape: f32[1,32], index: 2, kind: input, shape index: {}]   ;;  %s635_s3 = inlined_call_operand.vmem [shape: f32[32,32], index: 3, kind: input, shape index: {}]   ;;  %s636_s4 = inlined_call_operand.vmem [shape: f32[1,32], index: 4, kind: input, shape index: {}]   ;;  %s637_s5 = inlined_call_operand.vmem [shape: f32[64,32], index: 5, kind: output, shape index: {}]  }
   0x1 LB: > { %s475_s19 = sadd.s32 4294967295, %s540_s18   ;;  %p479_p0 = scmp.ge.s32.totalorder %s540_s18, 1  ;;  %s540_s18 = sphi %s572_s18, %s15_s18  }
   0x2   : > { %p188_p1 = scmp.lt.s32.totalorder %s540_s18, 5 }
   0x4   : > { %p189_p2 = pnand %p479_p0, %p188_p1 }
   0x5   : > { %s480_s24 = sshll.u32 (!%p189_p2), %s475_s19, 1 }
   0x6   : > { %192 = sbr.rel (%p189_p2) target bundleno = 418 (0x1a2), region = 40  ;;  %p217_p3 = scmp.lt.s32.totalorder (!%p189_p2), %s480_s24, 7 }
   0xb   : > { %v233_v0 = vld [vmem:[%s633_s1 + $0x18] sm:$0xff]  ;;  %v232_v1 = vld [vmem:[%s633_s1 + $0x10] sm:$0xff]  ;;  %v231_v2 = vld [vmem:[%s633_s1 + $0x8] sm:$0xff]  ;;  %s639_s24 = smov (!%p217_p3, %s480_s24), 7  ;;  %vm241_vm0 = vcmask 261120  }
   0xc   : > { %504 = vmatprep.subr.mxu0 %v233_v0  ;;  %v230_v3 = vld [vmem:[%s633_s1] sm:$0xff]  ;;  %s481_s29 = sshll.u32 %s639_s24, 3  ;;  %v328_v6 = vld [vmem:[%s635_s3 + $0x18] sm:$0xff]  ;;  %v327_v7 = vld [vmem:[%s635_s3 + $0x10] sm:$0xff] }
   0xd   : > { %505 = vmatpush3.msra.mxu0 %v233_v0  ;;  %s220_s7 = scalar_lea.vmem %s632_s0, %s481_s29  ;;  %515 = vmatprep.subr.mxu1 %v328_v6  ;;  %v326_v8 = vld [vmem:[%s635_s3 + $0x8] sm:$0xff]  ;;  %v325_v9 = vld [vmem:[%s635_s3] sm:$0xff]  ;;  %s226_s23 = scalar_lea.vmem %s637_s5, %s481_s29 }
   0xe   : > { %506 = vmatprep.subr.mxu0 %v232_v1  ;;  %v228_v4 = vld [vmem:[%s220_s7] sm:$0xff]  ;;  %v229_v5 = vld [vmem:[%s220_s7 + $0x8] sm:$0xff]  ;;  %516 = vmatpush3.msra.mxu1 %v328_v6 }
   0xf   : > { %507 = vmatpush3.msra.mxu0 %v232_v1  ;;  %512 = vmatprep.mubr.msk.f32.mxu0 %vm241_vm0, %v228_v4  ;;  %v484_v10 = vld [vmem:[%s634_s2] ss:$0 sm:$0xff] }
  0x10   : > { %508 = vmatprep.subr.mxu0 %v231_v2  ;;  %517 = vmatprep.subr.mxu1 %v327_v7  ;;  %v487_v18 = vld [vmem:[%s636_s4] ss:$0 sm:$0xff] }
  0x11   : > { %509 = vmatpush3.msra.mxu0 %v231_v2  ;;  %518 = vmatpush3.msra.mxu1 %v327_v7 }
  0x12   : > { %510 = vmatprep.subr.mxu0 %v230_v3  ;;  %519 = vmatprep.subr.mxu1 %v326_v8 }
  0x13   : > { %511 = vmatpush3.msra.mxu0 %v230_v3  ;;  %520 = vmatpush3.msra.mxu1 %v326_v8 }
  0x14   : > { %513 = vmatmul.mubr.msk.f32.vlgmr.msra.gmra.mxu0 %vm241_vm0, %v229_v5  ;;  %521 = vmatprep.subr.mxu1 %v325_v9 }
  0x15   : > { %522 = vmatpush3.msra.mxu1 %v325_v9 }
  0xd4   : > { %v514_v11 = vpop.f32.mrf.mxu0 }
  0xd5   : > { %v320_v12 = vadd.f32 %v514_v11, %v484_v10 }
  0xd6   : > { %v314_v13 = vpop.f32.mrf.mxu0 }
  0xd7   : > { %v315_v14 = vadd.f32 %v484_v10, %v314_v13  ;;  %v324_v16 = vmax.f32 %v320_v12, 0.0 }
  0xd9   : > { %v323_v15 = vmax.f32 %v315_v14, 0.0 }
  0xdb   : > { %523 = vmatprep.mubr.msk.f32.mxu1 %vm241_vm0, %v323_v15 }
  0xdc   : > { %524 = vmatmul.mubr.msk.f32.vlgmr.msra.gmra.mxu1 %vm241_vm0, %v324_v16 }
 0x19c   : > { %v525_v17 = vpop.f32.mrf.mxu1 }
 0x19d   : > { %v414_v21 = vadd.f32 %v525_v17, %v487_v18 }
 0x19e   : > { %v408_v19 = vpop.f32.mrf.mxu1 }
 0x19f   : > { %v409_v20 = vadd.f32 %v487_v18, %v408_v19  ;;  %418 = vst.msk [vmem:[%s226_s23 + $0x8] sm:$0xff] %vm241_vm0, %v414_v21 }
 0x1a1   : > { %417 = vst.msk [vmem:[%s226_s23] sm:$0xff] %vm241_vm0, %v409_v20 }
 0x1a2 PF: > { %s15_s18 = sadd.s32 1, %s540_s18  }
 0x1a3   : > { %p12_p4 = scmp.ge.s32.totalorder %s15_s18, 6  }
 0x1a5   :  { %14 = sbr.rel (!%p12_p4) target bundleno = 1 (0x1), region = 70 }

</bundles_post_ra>
